<compile_context>
chip_gen: v7x
topology: tpu7x:2x2x1
jax: 0.10.0
libtpu: 0.0.40
codegen_flags: <defaults>
</compile_context>

<pallas_src>
import functools

import jax
import jax.numpy as jnp
from jax.experimental import pallas as pl
from jax.experimental.pallas import tpu as pltpu


# ----------------------------------------------------------------------------
# Pallas kernel: one batch-block of the 3x3 conv + ReLU as three shifted-window
# lane-dense matmuls accumulated in f32.
#   rows = (sample, out_row) pairs, cols = (out_col, out_channel) pairs.
# ----------------------------------------------------------------------------
def conv3x3_relu_kernel(x_ref, w_ref, b_ref, o_ref, acc_ref):
    # x_ref:   (bb, H+2, (W+2)*Cin)   bf16  halo-padded NHWC rows of bb samples
    # w_ref:   (3, (W+2)*Cin, W*Cout) bf16  banded per-kh conv weights (resident)
    # b_ref:   (1, W*Cout)            f32   bias tiled across W (lane-dense)
    # o_ref:   (bb*H, W*Cout)               lane-dense output block
    # acc_ref: (bb*H, W*Cout)         f32   VMEM accumulator scratch
    bb, hp2, kc = x_ref.shape
    h = hp2 - 2
    rows = bb * h

    # kh = 0 window initializes the accumulator; kh = 1, 2 accumulate.
    xk = x_ref[:, 0:h, :].reshape(rows, kc)
    acc_ref[...] = jnp.dot(xk, w_ref[0], preferred_element_type=jnp.float32)
    for kh in (1, 2):  # static unroll: two more shifted-window MXU dots
        xk = x_ref[:, kh:kh + h, :].reshape(rows, kc)
        acc_ref[...] += jnp.dot(xk, w_ref[kh],
                                preferred_element_type=jnp.float32)

    o_ref[...] = jnp.maximum(acc_ref[...] + b_ref[...], 0.0).astype(o_ref.dtype)


# ----------------------------------------------------------------------------
# Wrapper: reproduces ModelForker.forward.  Since the inner model is
# per-sample, the fork/cat over batch segments is the identity regrouping of
# the batch; n_models only controls how the batch WOULD be split.
# ----------------------------------------------------------------------------
@functools.partial(jax.jit, static_argnames=("n_models", "block_rows"))
def model_forker_forward(x_nchw, weight, bias, *, n_models, block_rows=512):
    del n_models  # does not affect the forward math (see note above)
    B, Cin, H, W = x_nchw.shape
    KH, KW, _, Cout = weight.shape
    assert (KH, KW) == (3, 3)

    Kc = (W + 2) * Cin            # per-kh contraction width
    N = W * Cout                  # lane-dense output columns: (w, cout) pairs

    # Samples per grid block: ~block_rows output rows per step keeps the DMA
    # pipeline near the HBM roofline while per-block VMEM stays small/fixed.
    # Keep the output block sublane-aligned (16 covers f32 and bf16 outputs)
    # when multi-block; otherwise fall back to one full-extent block.
    bb = min(max(1, block_rows // H), B)
    n_blocks = -(-B // bb)
    if n_blocks > 1 and (bb * H) % 16 != 0:
        bb, n_blocks = B, 1       # full-extent block shapes are always legal
    Bp = n_blocks * bb
    pad_b = Bp - B

    # NCHW -> NHWC, batch-remainder + 3x3 halo pad, flatten (W+2, Cin) into the
    # lane dim, cast to bf16 for the MXU — one fused pass under jit.
    # TODO(synk): the NCHW<->NHWC transposes only exist to match the PyTorch
    # layout convention; drop them if the surrounding model is NHWC already.
    x = jnp.transpose(x_nchw, (0, 2, 3, 1))
    xp = jnp.pad(x, ((0, pad_b), (1, 1), (1, 1), (0, 0)))     # (Bp,H+2,W+2,Cin)
    xp = xp.reshape(Bp, H + 2, Kc).astype(jnp.bfloat16)

    # Banded per-kh conv weights:
    #   wmat[kh, p*Cin + ci, w*Cout + co] = sum_kw [p == w + kw] * weight[kh,kw,ci,co]
    kw_i = jnp.arange(3)[:, None, None]
    p_i = jnp.arange(W + 2)[None, :, None]
    w_i = jnp.arange(W)[None, None, :]
    shift = (p_i == w_i + kw_i).astype(weight.dtype)          # (3, W+2, W)
    wmat = jnp.einsum("jpw,kjio->kpiwo", shift, weight)       # (3,W+2,Cin,W,Cout)
    wmat = wmat.reshape(3, Kc, N).astype(jnp.bfloat16)

    bias_rows = jnp.tile(bias, (W,)).reshape(1, N).astype(jnp.float32)

    out2d = pl.pallas_call(
        conv3x3_relu_kernel,
        out_shape=jax.ShapeDtypeStruct((Bp * H, N), x_nchw.dtype),
        grid_spec=pltpu.PrefetchScalarGridSpec(
            num_scalar_prefetch=0,
            grid=(n_blocks,),
            in_specs=[
                pl.BlockSpec((bb, H + 2, Kc), lambda i: (i, 0, 0)),
                pl.BlockSpec((3, Kc, N), lambda i: (0, 0, 0)),   # VMEM-resident
                pl.BlockSpec((1, N), lambda i: (0, 0)),          # VMEM-resident
            ],
            out_specs=pl.BlockSpec((bb * H, N), lambda i: (i, 0)),
            scratch_shapes=[pltpu.VMEM((bb * H, N), jnp.float32)],
        ),
        compiler_params=pltpu.CompilerParams(
            # Row blocks are independent -> pipelined on 1-TC chips and sharded
            # across the two TensorCores on v7x.
            dimension_semantics=("parallel",),
        ),
    )(xp, wmat, bias_rows)

    out = out2d.reshape(Bp, H, W, Cout)[:B]     # drop batch padding (if any)
    return jnp.transpose(out, (0, 3, 1, 2))     # back to NCHW (module convention)


# ----------------------------------------------------------------------------
# Plain-JAX reference (same math, bf16-rounded operands, f32 accumulation).
# ----------------------------------------------------------------------------
def reference_forward(x_nchw, weight, bias):
    x = jnp.transpose(x_nchw, (0, 2, 3, 1)).astype(jnp.bfloat16).astype(jnp.float32)
    w = weight.astype(jnp.bfloat16).astype(jnp.float32)
    y = jax.lax.conv_general_dilated(
        x, w, window_strides=(1, 1), padding="SAME",
        dimension_numbers=("NHWC", "HWIO", "NHWC"))
    y = jnp.maximum(y + bias[None, None, None, :].astype(jnp.float32), 0.0)
    return jnp.transpose(y, (0, 3, 1, 2))


if __name__ == "__main__":
    key = jax.random.PRNGKey(0)
    kx, kw, kb = jax.random.split(key, 3)

    # Small shapes consistent with an NCHW image model behind the forker.
    B, Cin, H, W = 8, 4, 16, 16
    Cout = 8                 # W * Cout = 128 -> output columns exactly lane-dense
    n_models = 4

    x = jax.random.normal(kx, (B, Cin, H, W), dtype=jnp.float32)
    # Deterministic synthetic parameters for the inner model (Conv2d 3x3 + ReLU).
    weight = 0.1 * jax.random.normal(kw, (3, 3, Cin, Cout), dtype=jnp.float32)
    bias = 0.1 * jax.random.normal(kb, (Cout,), dtype=jnp.float32)

    out = model_forker_forward(x, weight, bias, n_models=n_models)
    out = jax.block_until_ready(out)

    ref = reference_forward(x, weight, bias)
    assert out.shape == (B, Cout, H, W), out.shape
    assert jnp.allclose(out, ref, atol=1e-2, rtol=1e-2), \
        float(jnp.max(jnp.abs(out - ref)))

    # TODO(synk): torch.jit.fork's thread-level parallelism and the
    # multiprocessing.cpu_count() == 1 serial branch have no Pallas analogue;
    # the batch-regrouped kernel reproduces the forward math exactly.
    print("KERNEL_OK")
</pallas_src>

<mosaic_0001>
module attributes {stable_mosaic.version = 11 : i64} {
  func.func @conv3x3_relu_kernel(%arg0: i32, %arg1: memref<8x18x72xbf16, #tpu.memory_space<vmem>>, %arg2: memref<3x72x128xbf16, #tpu.memory_space<vmem>>, %arg3: memref<1x128xf32, #tpu.memory_space<vmem>>, %arg4: memref<128x128xf32, #tpu.memory_space<vmem>>, %arg5: memref<128x128xf32, #tpu.memory_space<vmem>>) attributes {dimension_semantics = [#tpu.dimension_semantics<parallel>], iteration_bounds = array<i64: 1>, scalar_prefetch = 0 : i64, scratch_operands = 1 : i64, tpu.core_type = #tpu.core_type<tc>, window_params = [{transform_indices = @transform_0, window_bounds = array<i64: 8, 18, 72>}, {pipeline_mode = #tpu.pipeline_mode<synchronous>, transform_indices = @transform_1, window_bounds = array<i64: 3, 72, 128>}, {pipeline_mode = #tpu.pipeline_mode<synchronous>, transform_indices = @transform_2, window_bounds = array<i64: 1, 128>}, {transform_indices = @transform_3, window_bounds = array<i64: 128, 128>}]} {
    %c0 = arith.constant 0 : index
    %c0_0 = arith.constant 0 : index
    %c0_1 = arith.constant 0 : index
    %0 = vector.load %arg1[%c0, %c0_0, %c0_1] : memref<8x18x72xbf16, #tpu.memory_space<vmem>>, vector<8x16x72xbf16>
    %1 = vector.shape_cast %0 : vector<8x16x72xbf16> to vector<128x72xbf16>
    %c0_2 = arith.constant 0 : index
    %c0_3 = arith.constant 0 : index
    %c0_4 = arith.constant 0 : index
    %2 = vector.load %arg2[%c0_2, %c0_3, %c0_4] : memref<3x72x128xbf16, #tpu.memory_space<vmem>>, vector<1x72x128xbf16>
    %3 = vector.shape_cast %2 : vector<1x72x128xbf16> to vector<72x128xbf16>
    %cst = arith.constant dense<0.000000e+00> : vector<128x128xf32>
    %4 = tpu.matmul %1, %3, %cst {dimension_numbers = #tpu.dot_dimension_numbers<[1], [0], [0], [1], [0, 0, 1, 1], [], []>} : vector<128x72xbf16>, vector<72x128xbf16>, vector<128x128xf32> -> vector<128x128xf32>
    %c0_5 = arith.constant 0 : index
    %c0_6 = arith.constant 0 : index
    %5 = vector.load %arg5[%c0_5, %c0_6] : memref<128x128xf32, #tpu.memory_space<vmem>>, vector<128x128xf32>
    tpu.vector_store %arg5[%c0_5, %c0_6], %4 {strides = array<i32>} : memref<128x128xf32, #tpu.memory_space<vmem>>, vector<128x128xf32>,
    %c0_7 = arith.constant 0 : index
    %c1 = arith.constant 1 : index
    %c0_8 = arith.constant 0 : index
    %6 = vector.load %arg1[%c0_7, %c1, %c0_8] : memref<8x18x72xbf16, #tpu.memory_space<vmem>>, vector<8x16x72xbf16>
    %7 = vector.shape_cast %6 : vector<8x16x72xbf16> to vector<128x72xbf16>
    %c0_9 = arith.constant 0 : index
    %c0_10 = arith.constant 0 : index
    %8 = vector.load %arg5[%c0_9, %c0_10] : memref<128x128xf32, #tpu.memory_space<vmem>>, vector<128x128xf32>
    %c1_11 = arith.constant 1 : index
    %c0_12 = arith.constant 0 : index
    %c0_13 = arith.constant 0 : index
    %9 = vector.load %arg2[%c1_11, %c0_12, %c0_13] : memref<3x72x128xbf16, #tpu.memory_space<vmem>>, vector<1x72x128xbf16>
    %10 = vector.shape_cast %9 : vector<1x72x128xbf16> to vector<72x128xbf16>
    %cst_14 = arith.constant dense<0.000000e+00> : vector<128x128xf32>
    %11 = tpu.matmul %7, %10, %cst_14 {dimension_numbers = #tpu.dot_dimension_numbers<[1], [0], [0], [1], [0, 0, 1, 1], [], []>} : vector<128x72xbf16>, vector<72x128xbf16>, vector<128x128xf32> -> vector<128x128xf32>
    %12 = arith.addf %8, %11 : vector<128x128xf32>
    %c0_15 = arith.constant 0 : index
    %c0_16 = arith.constant 0 : index
    %13 = vector.load %arg5[%c0_15, %c0_16] : memref<128x128xf32, #tpu.memory_space<vmem>>, vector<128x128xf32>
    tpu.vector_store %arg5[%c0_15, %c0_16], %12 {strides = array<i32>} : memref<128x128xf32, #tpu.memory_space<vmem>>, vector<128x128xf32>,
    %c0_17 = arith.constant 0 : index
    %c2 = arith.constant 2 : index
    %c0_18 = arith.constant 0 : index
    %14 = vector.load %arg1[%c0_17, %c2, %c0_18] : memref<8x18x72xbf16, #tpu.memory_space<vmem>>, vector<8x16x72xbf16>
    %15 = vector.shape_cast %14 : vector<8x16x72xbf16> to vector<128x72xbf16>
    %c0_19 = arith.constant 0 : index
    %c0_20 = arith.constant 0 : index
    %16 = vector.load %arg5[%c0_19, %c0_20] : memref<128x128xf32, #tpu.memory_space<vmem>>, vector<128x128xf32>
    %c2_21 = arith.constant 2 : index
    %c0_22 = arith.constant 0 : index
    %c0_23 = arith.constant 0 : index
    %17 = vector.load %arg2[%c2_21, %c0_22, %c0_23] : memref<3x72x128xbf16, #tpu.memory_space<vmem>>, vector<1x72x128xbf16>
    %18 = vector.shape_cast %17 : vector<1x72x128xbf16> to vector<72x128xbf16>
    %cst_24 = arith.constant dense<0.000000e+00> : vector<128x128xf32>
    %19 = tpu.matmul %15, %18, %cst_24 {dimension_numbers = #tpu.dot_dimension_numbers<[1], [0], [0], [1], [0, 0, 1, 1], [], []>} : vector<128x72xbf16>, vector<72x128xbf16>, vector<128x128xf32> -> vector<128x128xf32>
    %20 = arith.addf %16, %19 : vector<128x128xf32>
    %c0_25 = arith.constant 0 : index
    %c0_26 = arith.constant 0 : index
    %21 = vector.load %arg5[%c0_25, %c0_26] : memref<128x128xf32, #tpu.memory_space<vmem>>, vector<128x128xf32>
    tpu.vector_store %arg5[%c0_25, %c0_26], %20 {strides = array<i32>} : memref<128x128xf32, #tpu.memory_space<vmem>>, vector<128x128xf32>,
    %c0_27 = arith.constant 0 : index
    %c0_28 = arith.constant 0 : index
    %22 = vector.load %arg5[%c0_27, %c0_28] : memref<128x128xf32, #tpu.memory_space<vmem>>, vector<128x128xf32>
    %c0_29 = arith.constant 0 : index
    %c0_30 = arith.constant 0 : index
    %23 = vector.load %arg3[%c0_29, %c0_30] : memref<1x128xf32, #tpu.memory_space<vmem>>, vector<1x128xf32>
    %24 = vector.broadcast %23 : vector<1x128xf32> to vector<128x128xf32>
    %25 = arith.addf %22, %24 : vector<128x128xf32>
    %cst_31 = arith.constant 0.000000e+00 : f32
    %26 = vector.broadcast %cst_31 : f32 to vector<128x128xf32>
    %27 = arith.maximumf %25, %26 : vector<128x128xf32>
    %c0_32 = arith.constant 0 : index
    %c0_33 = arith.constant 0 : index
    %28 = vector.load %arg4[%c0_32, %c0_33] : memref<128x128xf32, #tpu.memory_space<vmem>>, vector<128x128xf32>
    tpu.vector_store %arg4[%c0_32, %c0_33], %27 {strides = array<i32>} : memref<128x128xf32, #tpu.memory_space<vmem>>, vector<128x128xf32>,
    return
  }
  func.func @transform_0(%arg0: i32) -> (i32, i32, i32) {
    %c0_i32 = arith.constant 0 : i32
    %c0_i32_0 = arith.constant 0 : i32
    %c0_i32_1 = arith.constant 0 : i32
    return %arg0, %c0_i32, %c0_i32_0 : i32, i32, i32
  }
  func.func @transform_1(%arg0: i32) -> (i32, i32, i32) {
    %c0_i32 = arith.constant 0 : i32
    %c0_i32_0 = arith.constant 0 : i32
    %c0_i32_1 = arith.constant 0 : i32
    %c0_i32_2 = arith.constant 0 : i32
    return %c0_i32, %c0_i32_0, %c0_i32_1 : i32, i32, i32
  }
  func.func @transform_2(%arg0: i32) -> (i32, i32) {
    %c0_i32 = arith.constant 0 : i32
    %c0_i32_0 = arith.constant 0 : i32
    %c0_i32_1 = arith.constant 0 : i32
    return %c0_i32, %c0_i32_0 : i32, i32
  }
  func.func @transform_3(%arg0: i32) -> (i32, i32) {
    %c0_i32 = arith.constant 0 : i32
    %c0_i32_0 = arith.constant 0 : i32
    return %arg0, %c0_i32 : i32, i32
  }
}

</mosaic_0001>

<bundles_post_ra>
// kernel: tile.8
= control target key start
LH: loop header
LB: loop body
LE: loop exit
PB: predicated region body
PF: predicated region fallthrough
CT: control target
= control target key end

     0   :  { %s28_s0 = inlined_call_operand.vmem [shape: f32[8], index: 0, kind: input, shape index: {}]   ;;  %s29_s1 = inlined_call_operand.vmem [shape: f32[16,8], index: 1, kind: output, shape index: {}]  }
   0x1   :  { %v4_v0 = vld [vmem:[%s28_s0] ss:$0 sm:$0xff] }
   0x2   :  { %5 = vst [vmem:[%s29_s1] sm:$0xff] %v4_v0  ;;  %8 = vst [vmem:[%s29_s1 + $0x8] sm:$0xff] %v4_v0 }

// kernel: tile.9
= control target key start
LH: loop header
LB: loop body
LE: loop exit
PB: predicated region body
PF: predicated region fallthrough
CT: control target
= control target key end

     0   :  { %s131_s10 = smov 120   ;;  %s132_s11 = smov 104   ;;  %vm3_vm0 = vcmask 64512   ;;  %vm9_vm1 = vcmask 1048512   ;;  %vm15_vm2 = vcmask 982912   ;;  %vm21_vm3 = vcmask 917312   ;;  %s207_s0 = inlined_call_operand.vmem [shape: f32[16,8], index: 0, kind: input, shape index: {}]   ;;  %s208_s1 = inlined_call_operand.vmem [shape: f32[1,128], index: 1, kind: output, shape index: {}]  }
   0x1   :  { %v101_v0 = vld [vmem:[%s207_s0 + $0xf] sm:$0x1]   ;;  %v103_v1 = vld [vmem:[%s207_s0 + $0xd] sm:$0x1]   ;;  %v102_v2 = vld [vmem:[%s207_s0 + $0xe] sm:$0x1]  }
   0x2   :  { %7 = vrot.lane.b32.xlu0 %v101_v0, %s131_s10  ;;  %19 = vrot.lane.b32.xlu1 %v103_v1, %s132_s11  ;;  %v104_v3 = vld [vmem:[%s207_s0 + $0xc] sm:$0x1]   ;;  %s133_s16 = smov 112   ;;  %s134_s17 = smov 96   ;;  %v105_v4 = vld [vmem:[%s207_s0 + $0xb] sm:$0x1]  }
   0x3   :  { %v106_v5 = vld [vmem:[%s207_s0 + $0xa] sm:$0x1]   ;;  %v2_v6 = vld [vmem:[%s207_s0] sm:$0x1]   ;;  %s135_s24 = smov 88   ;;  %s136_s25 = smov 80  }
   0x4   :  { %4 = vst.msk [vmem:[#allocation0] sm:$0x1] %vm3_vm0, %v2_v6   ;;  %v107_v7 = vld [vmem:[%s207_s0 + $0x9] sm:$0x1]   ;;  %v108_v8 = vld [vmem:[%s207_s0 + $0x8] sm:$0x1]  }
   0x5   :  { %s137_s30 = smov 72   ;;  %s138_s2 = smov 64   ;;  %v109_v9 = vld [vmem:[%s207_s0 + $0x7] sm:$0x1]   ;;  %v110_v10 = vld [vmem:[%s207_s0 + $0x6] sm:$0x1]  }
   0x6   :  { %13 = vrot.lane.b32.xlu0 %v102_v2, %s133_s16  ;;  %25 = vrot.lane.b32.xlu1 %v104_v3, %s134_s17  ;;  %s139_s7 = smov 56   ;;  %s140_s8 = smov 48   ;;  %v111_v11 = vld [vmem:[%s207_s0 + $0x5] sm:$0x1]   ;;  %v112_v12 = vld [vmem:[%s207_s0 + $0x4] sm:$0x1]  }
   0x7   :  { %s141_s13 = smov 40   ;;  %s142_s14 = smov 32   ;;  %v113_v13 = vld [vmem:[%s207_s0 + $0x3] sm:$0x1]   ;;  %v114_v14 = vld [vmem:[%s207_s0 + $0x2] sm:$0x1]  }
   0x8   :  { %s143_s19 = smov 24   ;;  %s144_s20 = smov 16   ;;  %v115_v15 = vld [vmem:[%s207_s0 + $0x1] sm:$0x1]   ;;  %vm27_vm4 = vcmask 851712   ;;  %vm33_vm5 = vcmask 786112  }
   0x9   :  { %s145_s0 = smov 8   ;;  %vm39_vm6 = vcmask 720512   ;;  %vm45_vm7 = vcmask 654912   ;;  %vm51_vm8 = vcmask 589312   ;;  %vm57_vm9 = vcmask 523712  }
   0xa   :  { %31 = vrot.lane.b32.xlu0 %v105_v4, %s135_s24  ;;  %37 = vrot.lane.b32.xlu1 %v106_v5, %s136_s25  ;;  %vm63_vm10 = vcmask 458112   ;;  %vm69_vm11 = vcmask 392512   ;;  %vm75_vm12 = vcmask 326912   ;;  %vm81_vm13 = vcmask 261312  }
   0xb   :  { %vm87_vm14 = vcmask 195712   ;;  %vm93_vm15 = vcmask 130112  }
   0xe   :  { %43 = vrot.lane.b32.xlu0 %v107_v7, %s137_s30  ;;  %49 = vrot.lane.b32.xlu1 %v108_v8, %s138_s2 }
  0x12   :  { %55 = vrot.lane.b32.xlu0 %v109_v9, %s139_s7  ;;  %61 = vrot.lane.b32.xlu1 %v110_v10, %s140_s8 }
  0x16   :  { %67 = vrot.lane.b32.xlu0 %v111_v11, %s141_s13  ;;  %73 = vrot.lane.b32.xlu1 %v112_v12, %s142_s14 }
  0x1a   :  { %79 = vrot.lane.b32.xlu0 %v113_v13, %s143_s19  ;;  %85 = vrot.lane.b32.xlu1 %v114_v14, %s144_s20 }
  0x1e   :  { %91 = vrot.lane.b32.xlu0 %v115_v15, %s145_s0 }
  0x74   :  { %v8_v16 = vpop.permute.xlu0 %7   ;;  %v20_v17 = vpop.permute.xlu1 %19  }
  0x75   :  { %10 = vst.msk [vmem:[#allocation0] sm:$0x1] %vm9_vm1, %v8_v16  }
  0x78   :  { %v14_v18 = vpop.permute.xlu0 %13   ;;  %v26_v19 = vpop.permute.xlu1 %25  }
  0x79   :  { %16 = vst.msk [vmem:[#allocation0] sm:$0x1] %vm15_vm2, %v14_v18  }
  0x7a   :  { %22 = vst.msk [vmem:[#allocation0] sm:$0x1] %vm21_vm3, %v20_v17  }
  0x7b   :  { %28 = vst.msk [vmem:[#allocation0] sm:$0x1] %vm27_vm4, %v26_v19  }
  0x7c   :  { %v32_v20 = vpop.permute.xlu0 %31   ;;  %v38_v21 = vpop.permute.xlu1 %37  }
  0x7d   :  { %34 = vst.msk [vmem:[#allocation0] sm:$0x1] %vm33_vm5, %v32_v20  }
  0x7e   :  { %40 = vst.msk [vmem:[#allocation0] sm:$0x1] %vm39_vm6, %v38_v21  }
  0x80   :  { %v44_v22 = vpop.permute.xlu0 %43   ;;  %v50_v23 = vpop.permute.xlu1 %49  }
  0x81   :  { %46 = vst.msk [vmem:[#allocation0] sm:$0x1] %vm45_vm7, %v44_v22  }
  0x82   :  { %52 = vst.msk [vmem:[#allocation0] sm:$0x1] %vm51_vm8, %v50_v23  }
  0x84   :  { %v56_v24 = vpop.permute.xlu0 %55   ;;  %v62_v25 = vpop.permute.xlu1 %61  }
  0x85   :  { %58 = vst.msk [vmem:[#allocation0] sm:$0x1] %vm57_vm9, %v56_v24  }
  0x86   :  { %64 = vst.msk [vmem:[#allocation0] sm:$0x1] %vm63_vm10, %v62_v25  }
  0x88   :  { %v68_v26 = vpop.permute.xlu0 %67   ;;  %v74_v27 = vpop.permute.xlu1 %73  }
  0x89   :  { %70 = vst.msk [vmem:[#allocation0] sm:$0x1] %vm69_vm11, %v68_v26  }
  0x8a   :  { %76 = vst.msk [vmem:[#allocation0] sm:$0x1] %vm75_vm12, %v74_v27  }
  0x8c   :  { %v80_v28 = vpop.permute.xlu0 %79   ;;  %v86_v29 = vpop.permute.xlu1 %85  }
  0x8d   :  { %82 = vst.msk [vmem:[#allocation0] sm:$0x1] %vm81_vm13, %v80_v28  }
  0x8e   :  { %88 = vst.msk [vmem:[#allocation0] sm:$0x1] %vm87_vm14, %v86_v29  }
  0x90   :  { %v92_v30 = vpop.permute.xlu0 %91  }
  0x91   :  { %94 = vst.msk [vmem:[#allocation0] sm:$0x1] %vm93_vm15, %v92_v30  }
  0x98   :  { %v98_v31 = vld [vmem:[#allocation0] sm:$0x1] }
  0x99   :  { %100 = vst [vmem:[%s208_s1] sm:$0x1] %v98_v31 }

// kernel: model_forker_forward.1
= control target key start
LH: loop header
LB: loop body
LE: loop exit
PB: predicated region body
PF: predicated region fallthrough
CT: control target
= control target key end

     0   :  { %vm273_vm0 = vsmask.f32 3328  ;;  %vm274_vm1 = vsmask.f32 7440  ;;  %vm132_vm2 = vcmask 1043456   ;;  %vm107_vm3 = vcmask 588800   ;;  %s1819_s1 = inlined_call_operand.vmem [shape: bf16[3,72,128], index: 1, kind: input, shape index: {}]   ;;  %s1820_s0 = inlined_call_operand.vmem [shape: bf16[8,18,72], index: 0, kind: input, shape index: {}]   ;;  %s1821_s2 = inlined_call_operand.vmem [shape: f32[1,128], index: 2, kind: input, shape index: {}]   ;;  %s1822_s3 = inlined_call_operand.vmem [shape: f32[128,128], index: 3, kind: output, shape index: {}]  }
   0x1   :  { %v1369_v0 = vld [vmem:[%s1819_s1] sm:$0xff]   ;;  %v1371_v2 = vld [vmem:[%s1819_s1 + $0x8] sm:$0xff]   ;;  %v1373_v4 = vld [vmem:[%s1819_s1 + $0x10] sm:$0xff]   ;;  %vm749_vm5 = vcmask 1042432   ;;  %vm750_vm6 = vcmask 1046532  }
   0x2   :  { %v1370_v1 = vld [vmem:[%s1819_s1 + $0x24] sm:$0xff]   ;;  %1245 = vmatprep.subr.bf16.mxu1 %v1369_v0  ;;  %v1372_v3 = vld [vmem:[%s1819_s1 + $0x2c] sm:$0xff]   ;;  %v1374_v5 = vld [vmem:[%s1819_s1 + $0x34] sm:$0xff]  }
   0x3   :  { %1271 = vmatprep.subr.bf16.mxu0 %v1370_v1  ;;  %1246 = vmatpush3.bf16.msra.mxu1 %v1369_v0  ;;  %v1375_v6 = vld [vmem:[%s1819_s1 + $0x18] sm:$0xff]   ;;  %v1377_v8 = vld [vmem:[%s1819_s1 + $0x20] ss:$0 sps:$4 sm:$0xff]   ;;  %v1378_v9 = vld [vmem:[%s1819_s1 + $0x44] ss:$0 sps:$4 sm:$0xff]  }
   0x4   :  { %1272 = vmatpush3.bf16.msra.mxu0 %v1370_v1  ;;  %1247 = vmatprep.subr.bf16.mxu1 %v1371_v2  ;;  %v1376_v7 = vld [vmem:[%s1819_s1 + $0x3c] sm:$0xff]   ;;  %v250_v12 = vld [vmem:[%s1820_s0 + $0x4] sm:$0xf]  ;;  %v134_v13 = vsel %vm132_vm2, %v1377_v8, 0  ;;  %v251_v14 = vld [vmem:[%s1820_s0 + $0x8] sm:$0x1] }
   0x5   :  { %1273 = vmatprep.subr.bf16.mxu0 %v1372_v3  ;;  %v1379_v10 = vld [vmem:[%s1820_s0] sm:$0xff]   ;;  %v286_v17 = vshll.u32 %v250_v12, 16  ;;  %v290_v18 = vshrl.u32 %v250_v12, 16  ;;  %v296_v19 = vshll.u32 %v251_v14, 16  ;;  %v570_v20 = vsel %vm132_vm2, %v1378_v9, 0  ;;  %v1469_v33 = vld [vmem:[%s1819_s1 + $0x48] sm:$0xff]   ;;  %vm1474_vm4 = vmor %vm273_vm0, %vm274_vm1 }
   0x6   :  { %v249_v11 = vld [vmem:[%s1820_s0] sm:$0xf]  ;;  %1255 = vmatprep.mubr.msk.bf16.mxu1 %vm107_vm3, %v1379_v10  ;;  %v252_v24 = vld [vmem:[%s1820_s0 + $0xc] sm:$0xf]  ;;  %v253_v27 = vld [vmem:[%s1820_s0 + $0x10] sm:$0xf] }
   0x7   :  { %1248 = vmatpush3.bf16.msra.mxu1 %v1371_v2  ;;  %v277_v15 = vshrl.u32 %v249_v11, 16  ;;  %v280_v16 = vshll.u32 %v249_v11, 16  ;;  %v288_v23 = vrot.slane %v286_v17, 5  ;;  %v292_v25 = vrot.slane %v290_v18, 4  ;;  %v254_v28 = vld [vmem:[%s1820_s0 + $0x14] sm:$0x1]  ;;  %vm1622_vm7 = vmor %vm749_vm5, %vm750_vm6 }
   0x8   :  { %1274 = vmatpush3.bf16.msra.mxu0 %v1372_v3  ;;  %1249 = vmatprep.subr.bf16.mxu1 %v1373_v4  ;;  %v298_v26 = vrot.slane %v296_v19, 5  ;;  %v301_v30 = vshrl.u32 %v252_v24, 16  ;;  %v304_v31 = vshll.u32 %v252_v24, 16  ;;  %v310_v32 = vshll.u32 %v253_v27, 16  ;;  %v1380_v36 = vld [vmem:[%s1820_s0 + $0xc] sm:$0xff]   ;;  %v1382_v46 = vld [vmem:[%s1820_s0 + $0x18] sm:$0xff]  }
   0x9   :  { %1275 = vmatprep.subr.bf16.mxu0 %v1374_v5  ;;  %v279_v21 = vrot.slane %v277_v15, 4  ;;  %v282_v22 = vrot.slane %v280_v16, 5  ;;  %v293_v35 = vor.u32 %v292_v25, %v288_v23  ;;  %v314_v37 = vshrl.u32 %v253_v27, 16  ;;  %v255_v47 = vld [vmem:[%s1820_s0 + $0x18] sm:$0xf]  ;;  %v1383_v62 = vld [vmem:[%s1819_s1 + $0x50] sm:$0xff]  }
   0xa   :  { %v320_v38 = vshll.u32 %v254_v28, 16  ;;  %v303_v40 = vrot.slane %v301_v30, 4  ;;  %v306_v41 = vrot.slane %v304_v31, 5  ;;  %v312_v42 = vrot.slane %v310_v32, 5  ;;  %v256_v50 = vld [vmem:[%s1820_s0 + $0x1c] sm:$0xf] }
   0xb   :  { %1250 = vmatpush3.bf16.msra.mxu1 %v1373_v4  ;;  %v283_v29 = vor.u32 %v282_v22, %v279_v21  ;;  %v294_v43 = vrot.slane %v293_v35, 4  ;;  %v316_v44 = vrot.slane %v314_v37, 4  ;;  %v257_v51 = vld [vmem:[%s1820_s0 + $0x20] sm:$0x1]  ;;  %v325_v52 = vshrl.u32 %v255_v47, 16  ;;  %v1384_v10 = vld [vmem:[%s1820_s0 + $0x24] sm:$0xff]  }
   0xc   :  { %1276 = vmatpush3.bf16.msra.mxu0 %v1374_v5  ;;  %1251 = vmatprep.subr.bf16.mxu1 %v1375_v6  ;;  %v322_v45 = vrot.slane %v320_v38, 5  ;;  %v307_v49 = vor.u32 %v306_v41, %v303_v40  ;;  %v328_v53 = vshll.u32 %v255_v47, 16  ;;  %v334_v56 = vshll.u32 %v256_v50, 16  ;;  %v258_v5 = vld [vmem:[%s1820_s0 + $0x24] sm:$0xf]  ;;  %v1385_v17 = vld [vmem:[%s1819_s1 + $0x58] sm:$0xff]  }
   0xd   :  { %1277 = vmatprep.subr.bf16.mxu0 %v1376_v7  ;;  %v284_v39 = vrot.slane %v283_v29, 4  ;;  %v299_v54 = vsel %vm1474_vm4, %v294_v43, %v298_v26  ;;  %v317_v55 = vor.u32 %v316_v44, %v312_v42  ;;  %v338_v57 = vshrl.u32 %v256_v50, 16  ;;  %v260_v11 = vld [vmem:[%s1820_s0 + $0x2c] sm:$0x1]  ;;  %v1386_v25 = vld [vmem:[%s1820_s0 + $0x30] sm:$0xff]   ;;  %v1388_v41 = vld [vmem:[%s1819_s1 + $0x60] sm:$0xff]  }
   0xe   :  { %v308_v59 = vrot.slane %v307_v49, 4  ;;  %v327_v60 = vrot.slane %v325_v52, 4  ;;  %v330_v61 = vrot.slane %v328_v53, 5  ;;  %v336_v0 = vrot.slane %v334_v56, 5  ;;  %v261_v29 = vld [vmem:[%s1820_s0 + $0x30] sm:$0xf] }
   0xf   :  { %1252 = vmatpush3.bf16.msra.mxu1 %v1375_v6  ;;  %v289_v48 = vsel %vm1474_vm4, %v284_v39, %v288_v23  ;;  %v318_v63 = vrot.slane %v317_v55, 4  ;;  %v340_v1 = vrot.slane %v338_v57, 4  ;;  %v344_v2 = vshll.u32 %v257_v51, 16  ;;  %v259_v6 = vld [vmem:[%s1820_s0 + $0x28] sm:$0xf]  ;;  %v1387_v50 = vld [vmem:[%s1820_s0 + $0x3c] sm:$0xff]  }
  0x10   :  { %1278 = vmatpush3.bf16.msra.mxu0 %v1376_v7  ;;  %1365 = vmatprep.subr.msk.bf16.mxu1 %vm132_vm2, %v1377_v8  ;;  %v1146_v58 = vcombine.low %v289_v48, %v299_v54  ;;  %v313_v3 = vsel %vm1474_vm4, %v308_v59, %v312_v42  ;;  %v331_v4 = vor.u32 %v330_v61, %v327_v60  ;;  %v349_v12 = vshrl.u32 %v258_v5, 16  ;;  %v262_v30 = vld [vmem:[%s1820_s0 + $0x34] sm:$0xf]  ;;  %v265_v51 = vld [vmem:[%s1820_s0 + $0x40] sm:$0xf] }
  0x11   :  { %1366 = vmatprep.subr.msk.bf16.mxu0 %vm132_vm2, %v1378_v9  ;;  %v323_v7 = vsel %vm1474_vm4, %v318_v63, %v322_v45  ;;  %v341_v8 = vor.u32 %v340_v1, %v336_v0  ;;  %v346_v9 = vrot.slane %v344_v2, 5  ;;  %v352_v15 = vshll.u32 %v258_v5, 16  ;;  %v264_v45 = vld [vmem:[%s1820_s0 + $0x3c] sm:$0xf]  ;;  %v266_v54 = vld [vmem:[%s1820_s0 + $0x44] sm:$0x1] }
  0x12   :  { %1281 = vmatprep.mubr.msk.bf16.mxu0 %vm107_vm3, %v1146_v58  ;;  %v332_v14 = vrot.slane %v331_v4, 4  ;;  %v358_v16 = vshll.u32 %v259_v6, 16  ;;  %v351_v19 = vrot.slane %v349_v12, 4  ;;  %v368_v21 = vshll.u32 %v260_v11, 16  ;;  %v1389_v1 = vld [vmem:[%s1820_s0 + $0x48] sm:$0xff]  }
  0x13   :  { %1254 = vmatpush3.bf16.msra.mxu1 %v134_v13  ;;  %v1147_v13 = vcombine.low %v313_v3, %v323_v7  ;;  %v342_v18 = vrot.slane %v341_v8, 4  ;;  %v354_v23 = vrot.slane %v352_v15, 5  ;;  %v373_v35 = vshrl.u32 %v261_v29, 16 }
  0x14   :  { %1280 = vmatpush3.bf16.msra.mxu0 %v570_v20  ;;  %1323 = vmatprep.subr.bf16.mxu1 %v1469_v33  ;;  %v362_v20 = vshrl.u32 %v259_v6, 16  ;;  %v337_v22 = vsel %vm1474_vm4, %v332_v14, %v336_v0  ;;  %v360_v24 = vrot.slane %v358_v16, 5  ;;  %v370_v28 = vrot.slane %v368_v21, 5  ;;  %v267_v6 = vld [vmem:[%s1820_s0 + $0x48] sm:$0xf] }
  0x15   :  { %1297 = vmatprep.subr.bf16.mxu0 %v1469_v33  ;;  %v347_v26 = vsel %vm1474_vm4, %v342_v18, %v346_v9  ;;  %v355_v32 = vor.u32 %v354_v23, %v351_v19  ;;  %v382_v38 = vshll.u32 %v262_v30, 16  ;;  %v386_v39 = vshrl.u32 %v262_v30, 16  ;;  %v268_v9 = vld [vmem:[%s1820_s0 + $0x4c] sm:$0xf]  ;;  %v270_v21 = vld [vmem:[%s1820_s0 + $0x54] sm:$0xf] }
  0x16   :  { %1256 = vmatmul.mubr.msk.bf16.vlgmr.msra.gmra.mrb[0].mxu1 %vm107_vm3, %v1380_v36  ;;  %v364_v27 = vrot.slane %v362_v20, 4  ;;  %v1148_v31 = vcombine.low %v337_v22, %v347_v26  ;;  %v376_v36 = vshll.u32 %v261_v29, 16  ;;  %v375_v43 = vrot.slane %v373_v35, 4  ;;  %v271_v26 = vld [vmem:[%s1820_s0 + $0x58] sm:$0xf] }
  0x17   :  { %1328 = vmatpush3.bf16.msra.mxu1 %v1469_v33  ;;  %1259 = vmatprep.mubr.msk.bf16.mxu1 %vm107_vm3, %v1382_v46  ;;  %v356_v42 = vrot.slane %v355_v32, 4  ;;  %v384_v47 = vrot.slane %v382_v38, 5  ;;  %v388_v48 = vrot.slane %v386_v39, 4  ;;  %v397_v55 = vshrl.u32 %v264_v45, 16  ;;  %v272_v29 = vld [vmem:[%s1820_s0 + $0x5c] sm:$0x1] }
  0x18   :  { %1324 = vmatprep.subr.bf16.mxu1 %v1383_v62  ;;  %1282 = vmatmul.mubr.msk.bf16.vlgmr.msra.gmra.mrb[0].mxu0 %vm107_vm3, %v1147_v13  ;;  %v365_v37 = vor.u32 %v364_v27, %v360_v24  ;;  %v378_v44 = vrot.slane %v376_v36, 5  ;;  %v400_v56 = vshll.u32 %v264_v45, 16  ;;  %v406_v59 = vshll.u32 %v265_v51, 16  ;;  %v1390_v36 = vld [vmem:[%s1820_s0 + $0x54] sm:$0xff]   ;;  %v1391_v38 = vld [vmem:[%s1819_s1 + $0x68] ss:$0 sps:$4 sm:$0xff]  }
  0x19   :  { %1298 = vmatpush3.bf16.msra.mxu0 %v1469_v33  ;;  %v263_v33 = vld [vmem:[%s1820_s0 + $0x38] sm:$0x1]  ;;  %1285 = vmatprep.mubr.msk.bf16.mxu0 %vm107_vm3, %v1148_v31  ;;  %v361_v52 = vsel %vm1474_vm4, %v356_v42, %v360_v24  ;;  %v389_v58 = vor.u32 %v388_v48, %v384_v47  ;;  %v410_v60 = vshrl.u32 %v265_v51, 16  ;;  %v399_v63 = vrot.slane %v397_v55, 4  ;;  %v702_v48 = vld [vmem:[%s1820_s0 + $0x4] sm:$0xf] }
  0x1a   :  { %1299 = vmatprep.subr.bf16.mxu0 %v1383_v62  ;;  %v392_v40 = vshll.u32 %v263_v33, 16  ;;  %v366_v46 = vrot.slane %v365_v37, 4  ;;  %v379_v53 = vor.u32 %v378_v44, %v375_v43  ;;  %v402_v0 = vrot.slane %v400_v56, 5  ;;  %v701_v43 = vld [vmem:[%s1820_s0] sm:$0xe] }
  0x1b   :  { %1329 = vmatpush3.bf16.msra.mxu1 %v1383_v62  ;;  %v390_v2 = vrot.slane %v389_v58, 4  ;;  %v408_v3 = vrot.slane %v406_v59, 5  ;;  %v412_v4 = vrot.slane %v410_v60, 4  ;;  %v416_v5 = vshll.u32 %v266_v54, 16  ;;  %v713_v55 = vld [vmem:[%s1820_s0 + $0x30] sm:$0xe] }
  0x1c   :  { %1325 = vmatprep.subr.bf16.mxu1 %v1385_v17  ;;  %v394_v49 = vrot.slane %v392_v40, 5  ;;  %v371_v57 = vsel %vm1474_vm4, %v366_v46, %v370_v28  ;;  %v403_v8 = vor.u32 %v402_v0, %v399_v63  ;;  %v421_v11 = vshrl.u32 %v267_v6, 16  ;;  %v714_v60 = vld [vmem:[%s1820_s0 + $0x34] sm:$0xf]  ;;  %v715_v63 = vld [vmem:[%s1820_s0 + $0x38] sm:$0x1] }
  0x1d   :  { %1300 = vmatpush3.bf16.msra.mxu0 %v1383_v62  ;;  %v1149_v61 = vcombine.low %v361_v52, %v371_v57  ;;  %v380_v62 = vrot.slane %v379_v53, 4  ;;  %v424_v12 = vshll.u32 %v267_v6, 16  ;;  %v413_v14 = vor.u32 %v412_v4, %v408_v3  ;;  %v703_v52 = vld [vmem:[%s1820_s0 + $0x8] sm:$0x1]  ;;  %v704_v6 = vld [vmem:[%s1820_s0 + $0xc] sm:$0xe] }
  0x1e   :  { %1260 = vmatmul.mubr.msk.bf16.gmra.mrb[4].mxu1 %vm107_vm3, %v1384_v10  ;;  %1301 = vmatprep.subr.bf16.mxu0 %v1385_v17  ;;  %v269_v10 = vld [vmem:[%s1820_s0 + $0x50] sm:$0x1]  ;;  %v395_v13 = vsel %vm1474_vm4, %v390_v2, %v394_v49  ;;  %v418_v15 = vrot.slane %v416_v5, 5  ;;  %v430_v16 = vshll.u32 %v268_v9, 16  ;;  %v404_v18 = vrot.slane %v403_v8, 4 }
  0x1f   :  { %1330 = vmatpush3.bf16.msra.mxu1 %v1385_v17  ;;  %1263 = vmatprep.mubr.msk.bf16.mxu1 %vm107_vm3, %v1386_v25  ;;  %v385_v7 = vsel %vm1474_vm4, %v380_v62, %v384_v47  ;;  %v423_v19 = vrot.slane %v421_v11, 4  ;;  %v426_v20 = vrot.slane %v424_v12, 5  ;;  %v414_v22 = vrot.slane %v413_v14, 4  ;;  %v706_v12 = vld [vmem:[%s1820_s0 + $0x14] sm:$0x1] }
  0x20   :  { %1326 = vmatprep.subr.bf16.mxu1 %v1388_v41  ;;  %1286 = vmatmul.mubr.msk.bf16.gmra.mrb[4].mxu0 %vm107_vm3, %v1149_v61  ;;  %v432_v23 = vrot.slane %v430_v16, 5  ;;  %v434_v24 = vshrl.u32 %v268_v9, 16  ;;  %v440_v25 = vshll.u32 %v269_v10, 16  ;;  %v409_v27 = vsel %vm1474_vm4, %v404_v18, %v408_v3  ;;  %v717_v18 = vld [vmem:[%s1820_s0 + $0x40] sm:$0xf] }
  0x21   :  { %1302 = vmatpush3.bf16.msra.mxu0 %v1385_v17  ;;  %v1150_v17 = vcombine.low %v385_v7, %v395_v13  ;;  %v427_v28 = vor.u32 %v426_v20, %v423_v19  ;;  %v445_v30 = vshrl.u32 %v270_v21, 16  ;;  %v448_v31 = vshll.u32 %v270_v21, 16  ;;  %v705_v7 = vld [vmem:[%s1820_s0 + $0x10] sm:$0xf]  ;;  %v716_v13 = vld [vmem:[%s1820_s0 + $0x3c] sm:$0xe] }
  0x22   :  { %1303 = vmatprep.subr.bf16.mxu0 %v1388_v41  ;;  %v419_v32 = vsel %vm1474_vm4, %v414_v22, %v418_v15  ;;  %v436_v33 = vrot.slane %v434_v24, 4  ;;  %v442_v35 = vrot.slane %v440_v25, 5  ;;  %v454_v37 = vshll.u32 %v271_v26, 16  ;;  %v718_v22 = vld [vmem:[%s1820_s0 + $0x44] sm:$0x1] }
  0x23   :  { %1331 = vmatpush3.bf16.msra.mxu1 %v1388_v41  ;;  %1289 = vmatprep.mubr.msk.bf16.mxu0 %vm107_vm3, %v1150_v17  ;;  %v1151_v39 = vcombine.low %v409_v27, %v419_v32  ;;  %v428_v40 = vrot.slane %v427_v28, 4  ;;  %v450_v42 = vrot.slane %v448_v31, 5  ;;  %v458_v46 = vshrl.u32 %v271_v26, 16  ;;  %v707_v28 = vld [vmem:[%s1820_s0 + $0x18] sm:$0xe] }
  0x24   :  { %v437_v44 = vor.u32 %v436_v33, %v432_v23  ;;  %v456_v45 = vrot.slane %v454_v37, 5  ;;  %v464_v47 = vshll.u32 %v272_v29, 16  ;;  %1368 = vmatprep.subr.msk.bf16.mxu1 %vm132_vm2, %v1391_v38  ;;  %v910_v51 = vsel %vm132_vm2, %v1391_v38, 0  ;;  %v708_v29 = vld [vmem:[%s1820_s0 + $0x1c] sm:$0xf] }
  0x25   :  { %1304 = vmatpush3.bf16.msra.mxu0 %v1388_v41  ;;  %v447_v41 = vrot.slane %v445_v30, 4  ;;  %v433_v49 = vsel %vm1474_vm4, %v428_v40, %v432_v23  ;;  %v1167_v54 = vrot.slane %v701_v43, 9  ;;  %v460_v57 = vrot.slane %v458_v46, 4  ;;  %v709_v33 = vld [vmem:[%s1820_s0 + $0x20] sm:$0x1] }
  0x26   :  { %1264 = vmatmul.mubr.msk.bf16.gmra.mrb[8].mxu1 %vm107_vm3, %v1387_v50  ;;  %1367 = vmatprep.subr.msk.bf16.mxu0 %vm132_vm2, %v1391_v38  ;;  %v438_v56 = vrot.slane %v437_v44, 4  ;;  %v466_v58 = vrot.slane %v464_v47, 5  ;;  %v754_v59 = vrot.slane %v702_v48, 5  ;;  %v757_v62 = vrot.slane %v703_v52, 5  ;;  %v720_v40 = vld [vmem:[%s1820_s0 + $0x4c] sm:$0xf] }
  0x27   :  { %1267 = vmatprep.mubr.msk.bf16.mxu1 %vm107_vm3, %v1389_v1  ;;  %v451_v50 = vor.u32 %v450_v42, %v447_v41  ;;  %1332 = vmatpush3.bf16.msra.mxu1 %v910_v51  ;;  %v1171_v0 = vrot.slane %v713_v55, 9  ;;  %v782_v1 = vrot.slane %v714_v60, 5  ;;  %v461_v3 = vor.u32 %v460_v57, %v456_v45  ;;  %v721_v43 = vld [vmem:[%s1820_s0 + $0x50] sm:$0x1]  ;;  %v722_v57 = vld [vmem:[%s1820_s0 + $0x54] sm:$0xe] }
  0x28   :  { %1290 = vmatmul.mubr.msk.bf16.gmra.mrb[8].mxu0 %vm107_vm3, %v1151_v39  ;;  %v443_v2 = vsel %vm1474_vm4, %v438_v56, %v442_v35  ;;  %v755_v4 = vsel %vm1622_vm7, %v1167_v54, %v754_v59  ;;  %v756_v5 = vrot.slane %v754_v59, 4  ;;  %v785_v16 = vrot.slane %v715_v63, 5  ;;  %v719_v35 = vld [vmem:[%s1820_s0 + $0x48] sm:$0xe]  ;;  %v712_v56 = vld [vmem:[%s1820_s0 + $0x2c] sm:$0x1] }
  0x29   :  { %1306 = vmatpush3.bf16.msra.mxu0 %v910_v51  ;;  %v452_v61 = vrot.slane %v451_v50, 4  ;;  %v1152_v8 = vcombine.low %v433_v49, %v443_v2  ;;  %v783_v10 = vsel %vm1622_vm7, %v1171_v0, %v782_v1  ;;  %v784_v11 = vrot.slane %v782_v1, 4  ;;  %v710_v49 = vld [vmem:[%s1820_s0 + $0x24] sm:$0xe]  ;;  %v711_v50 = vld [vmem:[%s1820_s0 + $0x28] sm:$0xf] }
  0x2a   :  { %v462_v14 = vrot.slane %v461_v3, 4  ;;  %v758_v15 = vsel %vm1622_vm7, %v756_v5, %v757_v62  ;;  %v1168_v17 = vrot.slane %v704_v6, 9  ;;  %v761_v20 = vrot.slane %v705_v7, 5  ;;  %v723_v62 = vld [vmem:[%s1820_s0 + $0x58] sm:$0xf] }
  0x2b   :  { %v457_v9 = vsel %vm1474_vm4, %v452_v61, %v456_v45  ;;  %1293 = vmatprep.mubr.msk.bf16.mxu0 %vm107_vm3, %v1152_v8  ;;  %v1184_v19 = vcombine.low %v755_v4, %v758_v15  ;;  %v764_v21 = vrot.slane %v706_v12, 5  ;;  %v1172_v23 = vrot.slane %v716_v13, 9  ;;  %v724_v1 = vld [vmem:[%s1820_s0 + $0x5c] sm:$0x1] }
  0x2c   :  { %v467_v24 = vsel %vm1474_vm4, %v462_v14, %v466_v58  ;;  %v786_v25 = vsel %vm1622_vm7, %v784_v11, %v785_v16  ;;  %v789_v26 = vrot.slane %v717_v18, 5  ;;  %v792_v27 = vrot.slane %v718_v22, 5 }
  0x2d   :  { %v1153_v30 = vcombine.low %v457_v9, %v467_v24  ;;  %v1188_v31 = vcombine.low %v783_v10, %v786_v25  ;;  %v762_v32 = vsel %vm1622_vm7, %v1168_v17, %v761_v20  ;;  %v763_v34 = vrot.slane %v761_v20, 4 }
  0x2e   :  { %1268 = vmatmul.mubr.msk.bf16.gmra.mrb[12].mxu1 %vm107_vm3, %v1390_v36  ;;  %v790_v36 = vsel %vm1622_vm7, %v1172_v23, %v789_v26  ;;  %v791_v37 = vrot.slane %v789_v26, 4  ;;  %v1169_v38 = vrot.slane %v707_v28, 9  ;;  %v768_v39 = vrot.slane %v708_v29, 5 }
  0x2f   :  { %1315 = vmatprep.mubr.msk.bf16.mxu1 %vm107_vm3, %v1188_v31  ;;  %v765_v41 = vsel %vm1622_vm7, %v763_v34, %v764_v21  ;;  %v771_v42 = vrot.slane %v709_v33, 5  ;;  %v1173_v44 = vrot.slane %v719_v35, 9  ;;  %v796_v45 = vrot.slane %v720_v40, 5 }
  0x30   :  { %1294 = vmatmul.mubr.msk.bf16.gmra.mrb[12].mxu0 %vm107_vm3, %v1153_v30  ;;  %v793_v46 = vsel %vm1622_vm7, %v791_v37, %v792_v27  ;;  %v769_v47 = vsel %vm1622_vm7, %v1169_v38, %v768_v39  ;;  %v770_v48 = vrot.slane %v768_v39, 4  ;;  %v799_v55 = vrot.slane %v721_v43, 5 }
  0x31   :  { %1307 = vmatprep.mubr.msk.bf16.mxu0 %vm107_vm3, %v1184_v19  ;;  %v1189_v51 = vcombine.low %v790_v36, %v793_v46  ;;  %v797_v52 = vsel %vm1622_vm7, %v1173_v44, %v796_v45  ;;  %v798_v54 = vrot.slane %v796_v45, 4  ;;  %v1185_v58 = vcombine.low %v762_v32, %v765_v41  ;;  %v1749_v46 = vld [vmem:[%s1821_s2] ss:$0 sm:$0xff] }
  0x32   :  { %v772_v59 = vsel %vm1622_vm7, %v770_v48, %v771_v42  ;;  %v1170_v60 = vrot.slane %v710_v49, 9  ;;  %v775_v61 = vrot.slane %v711_v50, 5  ;;  %v778_v0 = vrot.slane %v712_v56, 5 }
  0x33   :  { %v800_v63 = vsel %vm1622_vm7, %v798_v54, %v799_v55  ;;  %v1174_v2 = vrot.slane %v722_v57, 9  ;;  %v803_v3 = vrot.slane %v723_v62, 5  ;;  %v1186_v4 = vcombine.low %v769_v47, %v772_v59 }
  0x34   :  { %v1190_v5 = vcombine.low %v797_v52, %v800_v63  ;;  %v777_v6 = vrot.slane %v775_v61, 4  ;;  %v806_v7 = vrot.slane %v724_v1, 5  ;;  %v776_v11 = vsel %vm1622_vm7, %v1170_v60, %v775_v61 }
  0x35   :  { %v804_v8 = vsel %vm1622_vm7, %v1174_v2, %v803_v3  ;;  %v805_v9 = vrot.slane %v803_v3, 4 }
  0x36   :  { %1316 = vmatmul.mubr.msk.bf16.vlgmr.msra.gmra.mrb[16].mxu1 %vm107_vm3, %v1189_v51  ;;  %v779_v12 = vsel %vm1622_vm7, %v777_v6, %v778_v0 }
  0x37   :  { %1319 = vmatprep.mubr.msk.bf16.mxu1 %vm107_vm3, %v1190_v5  ;;  %v807_v10 = vsel %vm1622_vm7, %v805_v9, %v806_v7  ;;  %v1187_v14 = vcombine.low %v776_v11, %v779_v12 }
  0x38   :  { %1308 = vmatmul.mubr.msk.bf16.vlgmr.msra.gmra.mrb[0].mxu0 %vm107_vm3, %v1185_v58  ;;  %v1191_v13 = vcombine.low %v804_v8, %v807_v10 }
  0x39   :  { %1311 = vmatprep.mubr.msk.bf16.mxu0 %vm107_vm3, %v1186_v4 }
  0x3e   :  { %1320 = vmatmul.mubr.msk.bf16.gmra.mrb[20].mxu1 %vm107_vm3, %v1191_v13 }
  0x40   :  { %1312 = vmatmul.mubr.msk.bf16.gmra.mrb[4].mxu0 %vm107_vm3, %v1187_v14 }
  0xe9   :  { %v1257_v15 = vpop.f32.mrb[0].mxu1 }
  0xea   :  { %v170_v16 = vpop.f32.mrb[1].mxu1 }
  0xeb   :  { %v1258_v17 = vpop.f32.mrb[2].mxu1 }
  0xec   :  { %v173_v18 = vpop.f32.mrb[3].mxu1 }
  0xf1   :  { %v1738_v19 = vpop.f32.mrb[4].mxu1 }
  0xf2   :  { %v1740_v20 = vpop.f32.mrb[5].mxu1 }
  0xf3   :  { %v1742_v21 = vpop.f32.mrb[6].mxu1 }
  0xf4   :  { %v1744_v22 = vpop.f32.mrb[7].mxu1 }
  0xf9   :  { %v1265_v53 = vpop.f32.mrb[8].mxu1 }
  0xfa   :  { %v202_v23 = vpop.f32.mrb[9].mxu1 }
  0xfb   :  { %v1266_v24 = vpop.f32.mrb[10].mxu1  ;;  %v1291_v26 = vpop.f32.mrb[8].mxu0 }
  0xfc   :  { %v205_v25 = vpop.f32.mrb[11].mxu1  ;;  %v679_v27 = vadd.f32 %v1291_v26, %v1265_v53  ;;  %v638_v28 = vpop.f32.mrb[9].mxu0 }
  0xfd   :  { %v677_v30 = vadd.f32 %v638_v28, %v202_v23  ;;  %v1292_v31 = vpop.f32.mrb[10].mxu0 }
  0xfe   :  { %v680_v34 = vadd.f32 %v1292_v31, %v1266_v24  ;;  %v641_v33 = vpop.f32.mrb[11].mxu0 }
  0xff   :  { %v678_v36 = vadd.f32 %v641_v33, %v205_v25 }
 0x101   :  { %v1269_v29 = vpop.f32.mrb[12].mxu1 }
 0x102   :  { %v218_v32 = vpop.f32.mrb[13].mxu1 }
 0x103   :  { %v1270_v35 = vpop.f32.mrb[14].mxu1  ;;  %v1295_v38 = vpop.f32.mrb[12].mxu0 }
 0x104   :  { %v221_v37 = vpop.f32.mrb[15].mxu1  ;;  %v683_v39 = vadd.f32 %v1295_v38, %v1269_v29  ;;  %v654_v40 = vpop.f32.mrb[13].mxu0 }
 0x105   :  { %v681_v41 = vadd.f32 %v654_v40, %v218_v32  ;;  %v1296_v42 = vpop.f32.mrb[14].mxu0 }
 0x106   :  { %v684_v43 = vadd.f32 %v1296_v42, %v1270_v35  ;;  %v657_v44 = vpop.f32.mrb[15].mxu0 }
 0x107   :  { %v682_v45 = vadd.f32 %v657_v44, %v221_v37 }
 0x109   :  { %v1317_v47 = vpop.f32.mrb[16].mxu1 }
 0x10a   :  { %v1019_v48 = vadd.f32 %v1317_v47, %v679_v27  ;;  %v978_v49 = vpop.f32.mrb[17].mxu1 }
 0x10b   :  { %v1017_v50 = vadd.f32 %v978_v49, %v677_v30  ;;  %v1318_v51 = vpop.f32.mrb[18].mxu1  ;;  %v1309_v56 = vpop.f32.mrb[0].mxu0 }
 0x10c   :  { %v1074_v52 = vadd.f32 %v1749_v46, %v1019_v48  ;;  %v1020_v54 = vadd.f32 %v1318_v51, %v680_v34  ;;  %v981_v55 = vpop.f32.mrb[19].mxu1  ;;  %v1333_v59 = vadd.f32 %v1309_v56, %v1257_v15  ;;  %v946_v61 = vpop.f32.mrb[1].mxu0 }
 0x10d   :  { %v1072_v57 = vadd.f32 %v1749_v46, %v1017_v50  ;;  %v1018_v58 = vadd.f32 %v981_v55, %v678_v36  ;;  %v1334_v63 = vadd.f32 %v946_v61, %v170_v16  ;;  %v1310_v1 = vpop.f32.mrb[2].mxu0 }
 0x10e   :  { %v1090_v60 = vmax.f32 %v1074_v52, 0.0  ;;  %v1075_v62 = vadd.f32 %v1749_v46, %v1020_v54  ;;  %v1066_v3 = vadd.f32 %v1333_v59, %v1749_v46  ;;  %v1335_v4 = vadd.f32 %v1310_v1, %v1258_v17  ;;  %v949_v6 = vpop.f32.mrb[3].mxu0 }
 0x10f   :  { %v1088_v0 = vmax.f32 %v1072_v57, 0.0  ;;  %v1073_v2 = vadd.f32 %v1749_v46, %v1018_v58  ;;  %v1064_v7 = vadd.f32 %v1334_v63, %v1749_v46  ;;  %v1336_v8 = vadd.f32 %v949_v6, %v173_v18 }
 0x110   :  { %1106 = vst [vmem:[%s1822_s3 + $0x50] sm:$0xff] %v1090_v60  ;;  %v1091_v5 = vmax.f32 %v1075_v62, 0.0  ;;  %v1082_v11 = vmax.f32 %v1066_v3, 0.0  ;;  %v1067_v12 = vadd.f32 %v1335_v4, %v1749_v46 }
 0x111   :  { %1104 = vst [vmem:[%s1822_s3 + $0x40] sm:$0xff] %v1088_v0  ;;  %v1089_v9 = vmax.f32 %v1073_v2, 0.0  ;;  %v1321_v10 = vpop.f32.mrb[20].mxu1  ;;  %v1080_v15 = vmax.f32 %v1064_v7, 0.0  ;;  %v1065_v16 = vadd.f32 %v1336_v8, %v1749_v46 }
 0x112   :  { %1107 = vst [vmem:[%s1822_s3 + $0x58] sm:$0xff] %v1091_v5  ;;  %v1023_v13 = vadd.f32 %v1321_v10, %v683_v39  ;;  %v994_v14 = vpop.f32.mrb[21].mxu1  ;;  %1098 = vst [vmem:[%s1822_s3 + $0x10] sm:$0xff] %v1082_v11  ;;  %v1083_v53 = vmax.f32 %v1067_v12, 0.0 }
 0x113   :  { %1105 = vst [vmem:[%s1822_s3 + $0x48] sm:$0xff] %v1089_v9  ;;  %v1021_v17 = vadd.f32 %v994_v14, %v681_v41  ;;  %v1322_v18 = vpop.f32.mrb[22].mxu1  ;;  %1096 = vst [vmem:[%s1822_s3] sm:$0xff] %v1080_v15  ;;  %v1081_v26 = vmax.f32 %v1065_v16, 0.0  ;;  %v1313_v27 = vpop.f32.mrb[4].mxu0 }
 0x114   :  { %v1078_v23 = vadd.f32 %v1749_v46, %v1023_v13  ;;  %v1024_v24 = vadd.f32 %v1322_v18, %v684_v43  ;;  %v997_v25 = vpop.f32.mrb[23].mxu1  ;;  %1099 = vst [vmem:[%s1822_s3 + $0x18] sm:$0xff] %v1083_v53  ;;  %v1337_v30 = vadd.f32 %v1313_v27, %v1738_v19  ;;  %v962_v32 = vpop.f32.mrb[5].mxu0 }
 0x115   :  { %v1076_v28 = vadd.f32 %v1749_v46, %v1021_v17  ;;  %v1022_v29 = vadd.f32 %v997_v25, %v682_v45  ;;  %1097 = vst [vmem:[%s1822_s3 + $0x8] sm:$0xff] %v1081_v26  ;;  %v1338_v33 = vadd.f32 %v962_v32, %v1740_v20  ;;  %v1314_v36 = vpop.f32.mrb[6].mxu0 }
 0x116   :  { %v1094_v31 = vmax.f32 %v1078_v23, 0.0  ;;  %v1079_v34 = vadd.f32 %v1749_v46, %v1024_v24  ;;  %v1070_v38 = vadd.f32 %v1337_v30, %v1749_v46  ;;  %v1339_v19 = vadd.f32 %v1314_v36, %v1742_v21  ;;  %v965_v40 = vpop.f32.mrb[7].mxu0 }
 0x117   :  { %v1092_v35 = vmax.f32 %v1076_v28, 0.0  ;;  %v1077_v37 = vadd.f32 %v1749_v46, %v1022_v29  ;;  %v1068_v41 = vadd.f32 %v1338_v33, %v1749_v46  ;;  %v1340_v20 = vadd.f32 %v965_v40, %v1744_v22 }
 0x118   :  { %1110 = vst [vmem:[%s1822_s3 + $0x70] sm:$0xff] %v1094_v31  ;;  %v1095_v39 = vmax.f32 %v1079_v34, 0.0  ;;  %v1086_v43 = vmax.f32 %v1070_v38, 0.0  ;;  %v1071_v44 = vadd.f32 %v1339_v19, %v1749_v46 }
 0x119   :  { %1108 = vst [vmem:[%s1822_s3 + $0x60] sm:$0xff] %v1092_v35  ;;  %v1093_v42 = vmax.f32 %v1077_v37, 0.0  ;;  %v1084_v45 = vmax.f32 %v1068_v41, 0.0  ;;  %v1069_v21 = vadd.f32 %v1340_v20, %v1749_v46 }
 0x11a   :  { %1111 = vst [vmem:[%s1822_s3 + $0x78] sm:$0xff] %v1095_v39  ;;  %1102 = vst [vmem:[%s1822_s3 + $0x30] sm:$0xff] %v1086_v43  ;;  %v1087_v22 = vmax.f32 %v1071_v44, 0.0 }
 0x11b   :  { %1109 = vst [vmem:[%s1822_s3 + $0x68] sm:$0xff] %v1093_v42  ;;  %1100 = vst [vmem:[%s1822_s3 + $0x20] sm:$0xff] %v1084_v45  ;;  %v1085_v47 = vmax.f32 %v1069_v21, 0.0 }
 0x11c   :  { %1103 = vst [vmem:[%s1822_s3 + $0x38] sm:$0xff] %v1087_v22 }
 0x11d   :  { %1101 = vst [vmem:[%s1822_s3 + $0x28] sm:$0xff] %v1085_v47 }

</bundles_post_ra>
